<compile_context>
chip_gen: v6e
topology: v6e:2x2x1
jax: 0.10.0
libtpu: 0.0.40
codegen_flags: <defaults>
</compile_context>

<pallas_src>
import jax
import jax.numpy as jnp
from jax.experimental import pallas as pl
from jax.experimental.pallas import tpu as pltpu


def vector_encoder_kernel(idx_ref, emb_t_ref, o_ref):
    """idx_ref  : (3, B_tile) int32 — offset indices into the fused table.
       emb_t_ref: (D, L_total) f32  — transposed [row; col; dir] fused table.
       o_ref    : (D, B_tile) f32   — tanh(row + col + dir), batch on lanes."""
    idx = idx_ref[...]                                   # (3, B_tile)
    l_total = emb_t_ref.shape[1]
    b_tile = idx.shape[1]

    # Multi-hot selection with batch on lanes: the three index rows broadcast
    # along sublanes (no lane extraction).  Offset ranges [0,L) / [L,2L) /
    # [2L,2L+2) are disjoint, so a single OR + one cast is exact.
    iota = jax.lax.broadcasted_iota(jnp.int32, (l_total, b_tile), 0)
    hot = ((iota == idx[0:1, :])
           | (iota == idx[1:2, :])
           | (iota == idx[2:3, :]))
    multihot = hot.astype(jnp.float32)                   # (L_total, B_tile)

    # Three gathers + two adds as one small MXU matmul: (D, L) @ (L, B_tile).
    enc = jnp.dot(emb_t_ref[...], multihot,
                  preferred_element_type=jnp.float32)    # (D, B_tile)
    o_ref[...] = jnp.tanh(enc)                           # lane-dense store


def vector_encoder_forward(rows, cols, dirs, params, *, b_tile=None):
    """Batched VectorEncoder forward.  rows/cols/dirs: (B,) int.  Returns (B, D)."""
    row_emb = params["row_emb"]
    length, d = row_emb.shape

    # Fused + transposed table (D, 2L+2).  Prefer the one prebuilt in
    # init_params (hoists the per-call concat/transpose off the forward path).
    emb_t = params.get("emb_t")
    if emb_t is None:
        emb_t = jnp.concatenate(
            [params["row_emb"], params["col_emb"], params["dir_emb"]], axis=0).T
    l_total = emb_t.shape[1]

    b = rows.shape[0]
    # (3, B): batch maps to lanes inside the kernel -> lane-dense output stores,
    # and the offset indices broadcast along sublanes when building the mask.
    idx = jnp.stack(
        [rows.astype(jnp.int32),
         cols.astype(jnp.int32) + length,
         dirs.astype(jnp.int32) + 2 * length],
        axis=0)                                           # (3, B)

    if b_tile is None:
        # Multiple of 128 (fills the MXU M dim, keeps stores unmasked), capped
        # at 512 (vreg pressure from the (L_total, b_tile) multihot).
        # TODO(synk): sweep per chip generation (128 on v5e, 256 on v6e/v7x).
        b_tile = max(128, min(512, 128 * pl.cdiv(b, 2 * 128)))

    # Pad so the grid has >= 2 steps (keeps both v7x TensorCores busy) and is a
    # multiple of the tile.  Padded columns are junk and sliced off below.
    b_pad = max(2 * b_tile, b_tile * pl.cdiv(b, b_tile))
    if b_pad != b:
        idx = jnp.pad(idx, ((0, 0), (0, b_pad - b)))

    out_t = pl.pallas_call(
        vector_encoder_kernel,
        out_shape=jax.ShapeDtypeStruct((d, b_pad), jnp.float32),
        grid_spec=pltpu.PrefetchScalarGridSpec(
            num_scalar_prefetch=0,
            grid=(b_pad // b_tile,),
            in_specs=[
                pl.BlockSpec((3, b_tile), lambda i: (0, i)),     # per-step indices
                pl.BlockSpec((d, l_total), lambda i: (0, 0)),    # fused table, resident
            ],
            out_specs=pl.BlockSpec((d, b_tile), lambda i: (0, i)),
        ),
        compiler_params=pltpu.CompilerParams(
            dimension_semantics=("parallel",)),   # batch axis sharded over v7x TCs
    )(idx, emb_t)

    # One transpose in the wrapper back to (B, D); padded columns dropped.
    return out_t.T[:b]


def init_params(key, length, in_sz):
    k_r, k_c, k_d = jax.random.split(key, 3)
    scale = 0.1
    row = scale * jax.random.normal(k_r, (length, in_sz), jnp.float32)
    col = scale * jax.random.normal(k_c, (length, in_sz), jnp.float32)
    drc = scale * jax.random.normal(k_d, (2, in_sz), jnp.float32)
    return {
        "row_emb": row,
        "col_emb": col,
        "dir_emb": drc,
        # Fused + transposed table built ONCE, off the forward path:
        # columns [0,L)=row, [L,2L)=col, [2L,2L+2)=dir.  Shape (D, 2L+2).
        "emb_t": jnp.concatenate([row, col, drc], axis=0).T,
    }


if __name__ == "__main__":
    length = 16   # board size: row/col indices in [0, length)
    in_sz = 32
    batch = 16    # number of moves encoded per call

    key = jax.random.PRNGKey(0)
    k_params, k_rows, k_cols, k_dirs = jax.random.split(key, 4)
    params = init_params(k_params, length, in_sz)

    rows = jax.random.randint(k_rows, (batch,), 0, length, jnp.int32)
    cols = jax.random.randint(k_cols, (batch,), 0, length, jnp.int32)
    dirs = jax.random.randint(k_dirs, (batch,), 0, 2, jnp.int32)

    out = vector_encoder_forward(rows, cols, dirs, params)
    out = jax.block_until_ready(out)

    # Pure-JAX reference: tanh(row_emb[row] + col_emb[col] + dir_emb[dir]).
    ref = jnp.tanh(params["row_emb"][rows]
                   + params["col_emb"][cols]
                   + params["dir_emb"][dirs])

    assert out.shape == (batch, in_sz)
    assert out[0].shape == (in_sz,)          # a single move's encoding, as in PyTorch
    assert jnp.allclose(out, ref, atol=1e-5, rtol=1e-5)
    print("KERNEL_OK")
</pallas_src>

<mosaic_0001>
module attributes {stable_mosaic.version = 11 : i64} {
  func.func @vector_encoder_kernel(%arg0: i32, %arg1: memref<3x128xi32, #tpu.memory_space<vmem>>, %arg2: memref<32x34xf32, #tpu.memory_space<vmem>>, %arg3: memref<32x128xf32, #tpu.memory_space<vmem>>) attributes {dimension_semantics = [#tpu.dimension_semantics<parallel>], iteration_bounds = array<i64: 2>, scalar_prefetch = 0 : i64, scratch_operands = 0 : i64, tpu.core_type = #tpu.core_type<tc>, window_params = [{transform_indices = @transform_0, window_bounds = array<i64: 3, 128>}, {pipeline_mode = #tpu.pipeline_mode<synchronous>, transform_indices = @transform_1, window_bounds = array<i64: 32, 34>}, {transform_indices = @transform_2, window_bounds = array<i64: 32, 128>}]} {
    %c0 = arith.constant 0 : index
    %c0_0 = arith.constant 0 : index
    %0 = vector.load %arg1[%c0, %c0_0] : memref<3x128xi32, #tpu.memory_space<vmem>>, vector<3x128xi32>
    %1 = tpu.iota {dimensions = array<i32: 0>} : vector<34x128xi32>
    %2 = vector.extract_strided_slice %0 {offsets = [0, 0], sizes = [1, 128], strides = [1, 1]} : vector<3x128xi32> to vector<1x128xi32>
    %3 = vector.broadcast %2 : vector<1x128xi32> to vector<34x128xi32>
    %4 = arith.cmpi eq, %1, %3 : vector<34x128xi32>
    %5 = vector.extract_strided_slice %0 {offsets = [1, 0], sizes = [1, 128], strides = [1, 1]} : vector<3x128xi32> to vector<1x128xi32>
    %6 = vector.broadcast %5 : vector<1x128xi32> to vector<34x128xi32>
    %7 = arith.cmpi eq, %1, %6 : vector<34x128xi32>
    %8 = arith.ori %4, %7 : vector<34x128xi1>
    %9 = vector.extract_strided_slice %0 {offsets = [2, 0], sizes = [1, 128], strides = [1, 1]} : vector<3x128xi32> to vector<1x128xi32>
    %10 = vector.broadcast %9 : vector<1x128xi32> to vector<34x128xi32>
    %11 = arith.cmpi eq, %1, %10 : vector<34x128xi32>
    %12 = arith.ori %8, %11 : vector<34x128xi1>
    %13 = arith.extui %12 : vector<34x128xi1> to vector<34x128xi32>
    %14 = arith.sitofp %13 : vector<34x128xi32> to vector<34x128xf32>
    %c0_1 = arith.constant 0 : index
    %c0_2 = arith.constant 0 : index
    %15 = vector.load %arg2[%c0_1, %c0_2] : memref<32x34xf32, #tpu.memory_space<vmem>>, vector<32x34xf32>
    %cst = arith.constant dense<0.000000e+00> : vector<32x128xf32>
    %16 = tpu.matmul %15, %14, %cst {dimension_numbers = #tpu.dot_dimension_numbers<[1], [0], [0], [1], [0, 0, 1, 1], [], []>} : vector<32x34xf32>, vector<34x128xf32>, vector<32x128xf32> -> vector<32x128xf32>
    %17 = math.tanh %16 : vector<32x128xf32>
    %c0_3 = arith.constant 0 : index
    %c0_4 = arith.constant 0 : index
    %18 = vector.load %arg3[%c0_3, %c0_4] : memref<32x128xf32, #tpu.memory_space<vmem>>, vector<32x128xf32>
    tpu.vector_store %arg3[%c0_3, %c0_4], %17 {strides = array<i32>} : memref<32x128xf32, #tpu.memory_space<vmem>>, vector<32x128xf32>,
    return
  }
  func.func @transform_0(%arg0: i32) -> (i32, i32) {
    %c0_i32 = arith.constant 0 : i32
    %c0_i32_0 = arith.constant 0 : i32
    return %c0_i32, %arg0 : i32, i32
  }
  func.func @transform_1(%arg0: i32) -> (i32, i32) {
    %c0_i32 = arith.constant 0 : i32
    %c0_i32_0 = arith.constant 0 : i32
    %c0_i32_1 = arith.constant 0 : i32
    return %c0_i32, %c0_i32_0 : i32, i32
  }
  func.func @transform_2(%arg0: i32) -> (i32, i32) {
    %c0_i32 = arith.constant 0 : i32
    %c0_i32_0 = arith.constant 0 : i32
    return %c0_i32, %arg0 : i32, i32
  }
}

</mosaic_0001>

<bundles_post_ra>
// kernel: tpu_custom_call.1
= control target key start
LH: loop header
LB: loop body
LE: loop exit
PB: predicated region body
PF: predicated region fallthrough
CT: control target
= control target key end

     0   :  { %7 = vsyncpa [#allocation3], 0  ;;  %s899_s0 = inlined_call_operand.hbm [shape: s32[3,256], index: 0, kind: input, shape index: {}]   ;;  %s900_s1 = inlined_call_operand.hbm [shape: f32[32,34], index: 1, kind: input, shape index: {}]   ;;  %s901_s2 = inlined_call_operand.hbm [shape: f32[32,256], index: 2, kind: output, shape index: {}]  }
   0x1   :  { %9 = vsyncpa [#allocation3 + $0x1], 0 }
   0x2   :  { %10 = vsyncpa [#allocation6], 0 }
   0x3   :  { %11 = vsyncpa [#allocation4], 0 }
   0x4   :  { %13 = vsyncpa [#allocation4 + $0x1], 0  ;;  %s722_s9 = smov 0   ;;  %s724_s10 = smov 0  }
   0x5   :  { %s726_s11 = smov 0   ;;  %s728_s12 = smov 0  }
   0x6 LB: > { %s743_s13 = sadd.s32 4294967295, %s695_s12   ;;  %s438_s14 = sadd.s32 4294967294, %s695_s12   ;;  %s695_s12 = sphi %s728_s12, %s926_s12   ;;  %s691_s11 = sphi %s726_s11, %s925_s11   ;;  %s687_s10 = sphi %s724_s10, %s924_s10   ;;  %s683_s9 = sphi %s722_s9, %s923_s9  }
   0x7   : > { %p39_p0 = scmp.ne.s32.totalorder %s687_s10, %s683_s9  ;;  %p902_p1 = scmp.eq.s32.totalorder %s743_s13, 0 }
   0x8   : > { %p90_p3 = scmp.eq.s32.totalorder %s438_s14, 1  ;;  %p439_p5 = scmp.ge.s32.totalorder %s695_s12, 1 }
   0x9   : > { %p752_p4 = por %p902_p1, %p39_p0  ;;  %p97_p7 = scmp.lt.s32.totalorder %s695_s12, 3 }
   0xa   : > { %p757_p6 = por %p90_p3, %p39_p0  ;;  %s697_s18 = smov [#allocation5]  }
   0xb   : > { %s907_s15 = scalar_select %p752_p4, 1, 0 }
   0xc   : > { %s908_s16 = scalar_select %p757_p6, 1, 0 }
   0xd   : > { %p762_p8 = pnand %p439_p5, %p97_p7  ;;  %s109_s19 = sshll.u32 %s697_s18, 4  ;;  %s110_s19 = int_to_ptr.vmem [resolvable:$true] %s109_s19 }
   0xe   : > { %s776_s21 = sadd.s32 1, %s695_s12   ;;  %s26_s22 = sadd.s32 1, %s691_s11 }
   0xf   : > { %s909_s17 = scalar_select %p762_p8, 1, 0 }
  0x10   : > { %p509_p9 = pneg %p762_p8  ;;  %s23_s23 = ssub.s32 %s695_s12, %s776_s21 }
  0x11   : > { %s584_s24 = scalar_lea.vmem %s110_s19, 512  ;;  %p592_p5 = scmp.lt.s32.totalorder %s110_s19, %s110_s19 }
  0x12   : > { %p771_p11 = pnand %p509_p9, %p902_p1  ;;  %p585_p13 = scmp.ne.s32.totalorder %s110_s19, %s584_s24 }
  0x13   : > { %p593_p7 = scmp.lt.s32.totalorder %s584_s24, %s584_s24 }
  0x14   : > { %p575_p12 = pneg %p771_p11 }
  0x15   : > { %p594_p10 = por %p593_p7, %p592_p5 }
  0x16   : > { %p587_p0 = pnand %p585_p13, %p575_p12 }
  0x18   : > { %p588_p3 = pneg %p587_p0 }
  0x1a   : > { %p595_p2 = pnand %p594_p10, %p588_p3 }
  0x1c   : > { %598 = shalt.err (!%p595_p2)
}
  0x1d   : > { %s698_s25 = smov 128   ;;  %s699_s26 = smov 8  }
  0x1e   : > { %512 = dma.hbm_to_vmem [thread:$0]  (!%p771_p11), %s900_s1, 512, %s110_s19, [#allocation6], %s698_s25, %s698_s25, %s699_s26  }
  0x1f   : > { %p24_p9 = scmp.eq.s32.totalorder %s23_s23, 0  ;;  %p33_p12 = scmp.ne.s32.totalorder %s691_s11, %s687_s10 }
  0x20   : > { %p34_p10 = scmp.eq.s32.totalorder %s695_s12, 0  ;;  %p522_p2 = scmp.lt.s32.totalorder %s695_s12, 2 }
  0x21   : > { %s793_s29 = scalar_select %p24_p9, %s691_s11, %s26_s22  }
  0x22   : > { %p35_p13 = por %p34_p10, %p33_p12  ;;  %p911_p0 = scmp.eq.s32.totalorder %s743_s13, 1 }
  0x23   : > { %s123_s3 = sand.u32 1, %s691_s11   ;;  %s443_s4 = sshll.u32 %s695_s12, 6 }
  0x24   : > { %p797_p3 = por %p911_p0, %p33_p12  ;;  %s442_s5 = sshll.u32 %s123_s3, 2 }
  0x25   : > { %s806_s8 = scalar_lea.hbm %s899_s0, %s443_s4  ;;  %s127_s14 = scalar_lea.vmem [#allocation2], %s442_s5 }
  0x26   : > { %s912_s30 = scalar_select %p797_p3, 1, 0 }
  0x27   : > { %s134_s18 = sshll.u32 %s127_s14, 4  ;;  %p808_p11 = pnand %p522_p2, %p35_p13  ;;  %s135_s18 = int_to_ptr.vmem [resolvable:$true] %s134_s18 }
  0x28   : > { %s124_s20 = scalar_lea.sflag [#allocation3], %s123_s3  ;;  %s599_s22 = scalar_lea.hbm %s806_s8, 64 }
  0x29   : > { %p600_p5 = scmp.ne.s32.totalorder %s806_s8, %s599_s22  ;;  %p601_p7 = pneg %p808_p11 }
  0x2a   : > { %s604_s25 = scalar_lea.hbm %s899_s0, 128  ;;  %p605_p10 = scmp.lt.s32.totalorder %s806_s8, %s899_s0 }
  0x2b   : > { %p602_p9 = pnand %p601_p7, %p600_p5  ;;  %p606_p2 = scmp.lt.s32.totalorder %s604_s25, %s599_s22 }
  0x2d   : > { %p603_p12 = pneg %p602_p9  ;;  %p607_p13 = por %p606_p2, %p605_p10 }
  0x2f   : > { %p608_p0 = pnand %p607_p13, %p603_p12 }
  0x31   : > { %611 = shalt.err (!%p608_p0)
}
  0x32   : > { %s612_s28 = scalar_lea.vmem %s135_s18, 64  ;;  %s700_s3 = smov [#allocation2]  }
  0x33   : > { %p613_p1 = scmp.ne.s32.totalorder %s135_s18, %s612_s28  ;;  %s617_s4 = sshll.u32 %s700_s3, 4  ;;  %s618_s4 = int_to_ptr.vmem [resolvable:$false] %s617_s4 }
  0x34   : > { %s619_s5 = scalar_lea.vmem %s618_s4, 128  ;;  %p620_p5 = scmp.lt.s32.totalorder %s135_s18, %s618_s4 }
  0x35   : > { %p615_p6 = pnand %p613_p1, %p601_p7  ;;  %p621_p9 = scmp.lt.s32.totalorder %s619_s5, %s612_s28 }
  0x37   : > { %p616_p3 = pneg %p615_p6  ;;  %p622_p4 = por %p621_p9, %p620_p5 }
  0x39   : > { %p623_p8 = pnand %p622_p4, %p616_p3 }
  0x3b   : > { %626 = shalt.err (!%p623_p8)
}
  0x3c   : > { %516 = dma.hbm_to_vmem [thread:$0]  (!%p808_p11), %s806_s8, 64, %s135_s18, %s124_s20  }
  0x3d   : > { %p914_p12 = scmp.ne.s32.totalorder %s909_s17, 0 }
  0x3e   : > { %s829_s6 = sand.u32 (!%p914_p12), 1, %s687_s10   ;;  %p915_p1 = scmp.ne.s32.totalorder (!%p914_p12), %s907_s15, 0 }
  0x3f   : > { %143 = sbr.rel (%p914_p12) target bundleno = 319 (0x13f), region = 28  ;;  %s445_s7 = sshll.u32 (!%p914_p12), %s829_s6, 2 }
  0x40   : > { %s146_s14 = scalar_lea.sflag (!%p914_p12), [#allocation3], %s829_s6  ;;  %s149_s22 = scalar_lea.vmem (!%p914_p12), [#allocation2], %s445_s7 }
  0x44   : > { %670 = dma.done.wait (%p915_p1), %s146_s14, 64  }
  0x45   : > { %672 = vsyncadd (%p915_p1), %s146_s14, 4294967232  ;;  %p916_p4 = scmp.eq.s32.totalorder %s743_s13, 0 }
  0x47   : > { %674 = dma.done.wait (%p916_p4), [#allocation6], 512   ;;  %p917_p6 = pmov %p916_p4 }
  0x48   : > { %v175_v0 = vlaneseq  ;;  %vm906_vm0 = vcmask 277504   ;;  %v174_v7 = vld [vmem:[%s149_s22] sm:$0x7]  ;;  %v228_v8 = vld [vmem:[#allocation5] sm:$0xff]  ;;  %v230_v9 = vld [vmem:[#allocation5 + $0x10] sm:$0xff]  ;;  %vm245_vm6 = vcmask 1041408  }
  0x49   : > { %676 = vsyncadd (%p917_p6), [#allocation6], 4294966784  ;;  %485 = vmatprep.mubr.msk.f32.mxu0 %vm906_vm0, %v228_v8  ;;  %488 = vmatprep.mubr.msk.f32.mxu1 %vm906_vm0, %v230_v9  ;;  %v701_v15 = vmov 0.0   ;;  %v702_v17 = vmov 1.0   ;;  %v229_v18 = vld [vmem:[#allocation5 + $0x8] sm:$0xff]  ;;  %v231_v19 = vld [vmem:[#allocation5 + $0x18] sm:$0xff] }
  0x4a   : > { %v176_v1 = vshrl.u32 %v175_v0, 7  ;;  %s447_s15 = sshll.u32 %s829_s6, 5  ;;  %s463_s17 = sshll.u32 %s743_s13, 7 }
  0x4b   : > { %s173_s8 = scalar_lea.vmem [#allocation7], %s447_s15  ;;  %s854_s23 = scalar_lea.hbm %s901_s2, %s463_s17 }
  0x4c   : > { %v183_v2 = vsub.s32 0, %v176_v1  ;;  %v192_v3 = vsub.s32 1, %v176_v1  ;;  %v206_v4 = vsub.s32 2, %v176_v1  ;;  %v180_v5 = vadd.s32 32, %v176_v1  ;;  %s355_s18 = sshll.u32 %s173_s8, 4  ;;  %s343_s13 = scalar_lea.sflag [#allocation4], %s829_s6  ;;  %s856_s18 = int_to_ptr.vmem [resolvable:$true] %s355_s18 }
  0x4d   : > { %v179_v6 = vadd.s32 24, %v176_v1  ;;  %v178_v13 = vadd.s32 16, %v176_v1  ;;  %v177_v14 = vadd.s32 8, %v176_v1  ;;  %s627_s24 = scalar_lea.vmem %s856_s18, 512  ;;  %p920_p3 = scmp.ne.s32.totalorder %s912_s30, 0 }
  0x4e   : > { %v184_v10 = vrot.slane %v174_v7, %v183_v2  ;;  %v193_v11 = vrot.slane %v174_v7, %v192_v3  ;;  %v207_v12 = vrot.slane %v174_v7, %v206_v4  ;;  %p628_p8 = scmp.ne.s32.totalorder %s856_s18, %s627_s24  ;;  %s703_s25 = smov [#allocation7]  }
  0x4f   : > { %s631_s26 = sshll.u32 %s703_s25, 4  ;;  %s632_s26 = int_to_ptr.vmem [resolvable:$false] %s631_s26 }
  0x50   : > { %vm189_vm1 = vcmp.eq.s32.totalorder %v180_v5, %v184_v10  ;;  %vm198_vm2 = vcmp.eq.s32.totalorder %v180_v5, %v193_v11  ;;  %vm212_vm3 = vcmp.eq.s32.totalorder %v180_v5, %v207_v12  ;;  %vm188_vm4 = vcmp.eq.s32.totalorder %v179_v6, %v184_v10  ;;  %p629_p11 = pnand %p628_p8, %p920_p3  ;;  %s633_s27 = scalar_lea.vmem %s632_s26, 1024 }
  0x51   : > { %vm203_vm5 = vmor %vm189_vm1, %vm198_vm2  ;;  %vm197_vm7 = vcmp.eq.s32.totalorder %v179_v6, %v193_v11  ;;  %vm211_vm8 = vcmp.eq.s32.totalorder %v179_v6, %v207_v12  ;;  %vm187_vm10 = vcmp.eq.s32.totalorder %v178_v13, %v184_v10  ;;  %vm196_vm11 = vcmp.eq.s32.totalorder %v178_v13, %v193_v11  ;;  %p634_p10 = scmp.lt.s32.totalorder %s856_s18, %s632_s26  ;;  %p635_p2 = scmp.lt.s32.totalorder %s633_s27, %s627_s24 }
  0x52   : > { %vm217_vm9 = vmor %vm203_vm5, %vm212_vm3  ;;  %vm210_vm13 = vcmp.eq.s32.totalorder %v178_v13, %v207_v12  ;;  %vm186_vm15 = vcmp.eq.s32.totalorder %v177_v14, %v184_v10  ;;  %vm195_vm0 = vcmp.eq.s32.totalorder %v177_v14, %v193_v11  ;;  %vm209_vm2 = vcmp.eq.s32.totalorder %v177_v14, %v207_v12  ;;  %p630_p7 = pneg %p629_p11 }
  0x53   : > { %v452_v16 = vsel %vm217_vm9, 1.0, %v701_v15  ;;  %vm202_vm12 = vmor %vm188_vm4, %vm197_vm7  ;;  %vm185_vm5 = vcmp.eq.s32.totalorder %v176_v1, %v184_v10  ;;  %vm194_vm4 = vcmp.eq.s32.totalorder %v176_v1, %v193_v11  ;;  %vm208_vm9 = vcmp.eq.s32.totalorder %v176_v1, %v207_v12  ;;  %p636_p13 = por %p635_p2, %p634_p10 }
  0x54   : > { %475 = vmatprep.subr.msk.mxu0 %vm245_vm6, %v452_v16  ;;  %491 = vmatprep.subr.msk.mxu1 %vm245_vm6, %v452_v16  ;;  %vm216_vm14 = vmor %vm202_vm12, %vm211_vm8 }
  0x55   : > { %476 = vmatpush3.msk.msra.mxu0 %vm245_vm6, %v452_v16  ;;  %496 = vmatpush3.msk.msra.mxu1 %vm245_vm6, %v452_v16  ;;  %vm201_vm1 = vmor %vm187_vm10, %vm196_vm11  ;;  %p637_p0 = pnand %p636_p13, %p630_p7 }
  0x56   : > { %477 = vmatprep.subr.msk.mxu0 %vm216_vm14, %v702_v17  ;;  %492 = vmatprep.subr.msk.mxu1 %vm216_vm14, %v702_v17  ;;  %vm215_vm3 = vmor %vm201_vm1, %vm210_vm13 }
  0x57   : > { %478 = vmatpush3.msk.msra.mxu0 %vm216_vm14, %v702_v17  ;;  %497 = vmatpush3.msk.msra.mxu1 %vm216_vm14, %v702_v17  ;;  %vm200_vm7 = vmor %vm186_vm15, %vm195_vm0  ;;  %vm918_vm0 = vcmask 277504  }
  0x58   : > { %479 = vmatprep.subr.msk.mxu0 %vm215_vm3, %v702_v17  ;;  %493 = vmatprep.subr.msk.mxu1 %vm215_vm3, %v702_v17  ;;  %vm214_vm8 = vmor %vm200_vm7, %vm209_vm2 }
  0x59   : > { %480 = vmatpush3.msk.msra.mxu0 %vm215_vm3, %v702_v17  ;;  %498 = vmatpush3.msk.msra.mxu1 %vm215_vm3, %v702_v17  ;;  %vm199_vm12 = vmor %vm185_vm5, %vm194_vm4 }
  0x5a   : > { %481 = vmatprep.subr.msk.mxu0 %vm214_vm8, %v702_v17  ;;  %494 = vmatprep.subr.msk.mxu1 %vm214_vm8, %v702_v17  ;;  %vm213_vm6 = vmor %vm199_vm12, %vm208_vm9 }
  0x5b   : > { %482 = vmatpush3.msk.msra.mxu0 %vm214_vm8, %v702_v17  ;;  %499 = vmatpush3.msk.msra.mxu1 %vm214_vm8, %v702_v17  ;;  %vm919_vm10 = vmmov %vm918_vm0 }
  0x5c   : > { %483 = vmatprep.subr.msk.mxu0 %vm213_vm6, %v702_v17  ;;  %495 = vmatprep.subr.msk.mxu1 %vm213_vm6, %v702_v17 }
  0x5d   : > { %484 = vmatpush3.msk.msra.mxu0 %vm213_vm6, %v702_v17  ;;  %500 = vmatpush3.msk.msra.mxu1 %vm213_vm6, %v702_v17 }
  0x5e   : > { %486 = vmatmul.mubr.msk.f32.vlgmr.msra.gmra.mxu0 %vm918_vm0, %v229_v18  ;;  %489 = vmatmul.mubr.msk.f32.vlgmr.msra.gmra.mxu1 %vm919_vm10, %v231_v19 }
 0x11e   : > { %v487_v20 = vpop.f32.mrf.mxu0  ;;  %v490_v21 = vpop.f32.mrf.mxu1 }
 0x11f   : > { %565 = vtanh.f32 %v487_v20 }
 0x120   : > { %567 = vtanh.f32 %v490_v21  ;;  %v315_v22 = vpop.f32.mrf.mxu0  ;;  %v325_v23 = vpop.f32.mrf.mxu1 }
 0x121   : > { %569 = vtanh.f32 %v315_v22 }
 0x122   : > { %571 = vtanh.f32 %v325_v23 }
 0x12c   : > { %v566_v24 = vpop.eup %565 }
 0x12d   : > { %v568_v25 = vpop.eup %567  ;;  %339 = vst [vmem:[%s173_s8 + $0x8] sm:$0xff] %v566_v24 }
 0x12e   : > { %v570_v26 = vpop.eup %569  ;;  %341 = vst [vmem:[%s173_s8 + $0x18] sm:$0xff] %v568_v25 }
 0x12f   : > { %v572_v27 = vpop.eup %571  ;;  %338 = vst [vmem:[%s173_s8] sm:$0xff] %v570_v26 }
 0x130   : > { %340 = vst [vmem:[%s173_s8 + $0x10] sm:$0xff] %v572_v27 }
 0x131   : > { %640 = shalt.err (!%p637_p0)
}
 0x132   : > { %s641_s28 = scalar_lea.hbm %s854_s23, 512  ;;  %s645_s5 = scalar_lea.hbm %s901_s2, 1024 }
 0x133   : > { %p642_p5 = scmp.ne.s32.totalorder %s854_s23, %s641_s28  ;;  %p646_p1 = scmp.lt.s32.totalorder %s854_s23, %s901_s2 }
 0x134   : > { %p647_p4 = scmp.lt.s32.totalorder %s645_s5, %s641_s28 }
 0x135   : > { %p643_p9 = pnand %p642_p5, %p920_p3 }
 0x136   : > { %p648_p6 = por %p647_p4, %p646_p1 }
 0x137   : > { %p644_p12 = pneg %p643_p9 }
 0x139   : > { %p649_p8 = pnand %p648_p6, %p644_p12 }
 0x13b   : > { %652 = shalt.err (!%p649_p8)
}
 0x13c   : > { %s704_s22 = smov 128   ;;  %s705_s15 = smov 256  }
 0x13d   : > { %s706_s17 = smov 8  }
 0x13e   : > { %507 = dma.vmem_to_hbm [thread:$0]  (%p920_p3), %s856_s18, 512, %s854_s23, %s343_s13, %s704_s22, %s705_s15, %s706_s17  }
 0x13f PF: > { %s370_s8 = sand.u32 1, %s683_s9   ;;  %p921_p11 = scmp.ne.s32.totalorder %s908_s16, 0 }
 0x140   : > { %p922_p7 = scmp.ge.s32.totalorder %s695_s12, 2  ;;  %s371_s19 = scalar_lea.sflag [#allocation4], %s370_s8 }
 0x142   : > { %p518_p10 = pnand %p922_p7, %p921_p11 }
 0x144   : > { %p519_p2 = pneg %p518_p10 }
 0x146   : > { %678 = dma.done.wait (%p519_p2), %s371_s19, 512  }
 0x147   : > { %680 = vsyncadd (%p519_p2), %s371_s19, 4294966784  ;;  %p16_p13 = scmp.ge.s32.totalorder %s776_s21, 4   ;;  %s923_s9 = smov %s687_s10 }
 0x148   : > { %s924_s10 = smov %s691_s11  ;;  %s925_s11 = smov %s793_s29 }
 0x149   : > { %s926_s12 = smov %s776_s21  ;;  %18 = sbr.rel (!%p16_p13) target bundleno = 6 (0x6), region = 77 }
 0x14e   :  { %376 = vsyncpa [#allocation3], 1 }
 0x14f   :  { %378 = vsyncpa [#allocation3 + $0x1], 1 }
 0x150   :  { %379 = vsyncpa [#allocation6], 1 }
 0x151   :  { %380 = vsyncpa [#allocation4], 1 }
 0x152   :  { %382 = vsyncpa [#allocation4 + $0x1], 1 }

</bundles_post_ra>
